<compile_context>
chip_gen: v5e
topology: v5e:2x2
jax: 0.10.0
libtpu: 0.0.40
codegen_flags: <defaults>
</compile_context>

<pallas_src>
import math
import functools

import jax
import jax.numpy as jnp
from jax.experimental import pallas as pl
from jax.experimental.pallas import tpu as pltpu


NUM_FEATURES = 57
HIDDEN1 = 32
HIDDEN2 = 16
NUM_CLASSES = 11

HIDDEN_PAD = 128   # lane-dense hidden widths (zero-padded, exact math)
CLASS_PAD = 128    # lane-dense logits (zero-padded, sliced back in wrapper)

_MAX_TB = 16384    # keeps double-buffered x/out tiles << 32 MiB scoped VMEM


def _round_up(x, m):
    return ((x + m - 1) // m) * m


def _cdiv(a, b):
    return -(-a // b)


def mlp_kernel(x_ref, w1_ref, b1_ref, w2_ref, b2_ref, w3_ref, b3_ref, out_ref):
    # In-kernel f32 -> bf16 cast of the streamed x tile (hidden under DMA).
    x = x_ref[...].astype(jnp.bfloat16)                          # (TB, F)

    # fc1 + ReLU  (MXU bf16, f32 accumulate)
    h1 = jnp.dot(x, w1_ref[...], preferred_element_type=jnp.float32)
    h1 = jnp.maximum(h1 + b1_ref[...], 0.0).astype(jnp.bfloat16)  # (TB, 128)

    # fc2 + ReLU
    h2 = jnp.dot(h1, w2_ref[...], preferred_element_type=jnp.float32)
    h2 = jnp.maximum(h2 + b2_ref[...], 0.0).astype(jnp.bfloat16)  # (TB, 128)

    # fc3 (logits, no activation) — lane-dense 128-wide unmasked bf16 store
    out = jnp.dot(h2, w3_ref[...], preferred_element_type=jnp.float32)
    out_ref[...] = (out + b3_ref[...]).astype(out_ref.dtype)


def _choose_tile(batch, block_rows):
    """Batch tile (multiple of 8, capped) + grid; prefer an even grid > 1 so
    the 'parallel' batch axis balances across v7x's two TensorCores."""
    block_rows = min(block_rows, _MAX_TB)
    tb = max(8, min(_round_up(block_rows, 8), _round_up(batch, 8)))
    grid = _cdiv(batch, tb)
    if grid > 1 and grid % 2 == 1:
        tb = max(8, _round_up(_cdiv(batch, grid + 1), 8))
        grid = _cdiv(batch, tb)
    return tb, grid


@functools.partial(jax.jit, static_argnames=("num_classes", "block_rows"))
def mlp_forward(x, params, *, num_classes=NUM_CLASSES, block_rows=2048):
    """x: (batch, num_features) f32.  params: padded bf16 weights / f32 biases.

    Returns bf16 logits of shape (batch, num_classes). (f32-accumulating MXU;
    bf16 store is plenty for pre-softmax/argmax logits.)
    """
    w1, b1, w2, b2, w3, b3 = params
    batch, feat = x.shape
    n_pad = w3.shape[1]

    tb, grid = _choose_tile(batch, block_rows)

    # Weights/biases: same block every grid step -> stay VMEM-resident.
    resident = lambda a: pl.BlockSpec(a.shape, lambda i: (0, 0))

    out = pl.pallas_call(
        mlp_kernel,
        out_shape=jax.ShapeDtypeStruct((batch, n_pad), jnp.bfloat16),
        grid=(grid,),
        in_specs=[
            pl.BlockSpec((tb, feat), lambda i: (i, 0)),   # x: batch-tiled, f32
            resident(w1), resident(b1),
            resident(w2), resident(b2),
            resident(w3), resident(b3),
        ],
        out_specs=pl.BlockSpec((tb, n_pad), lambda i: (i, 0)),
        compiler_params=pltpu.CompilerParams(
            # Batch tiles are independent -> shard across v7x's 2 TensorCores
            # (no-op on single-TC v5e/v6e).
            dimension_semantics=("parallel",),
            # VMEM: 2*(TB*57*4 + TB*128*2) + ~160 KiB resident weights; at the
            # TB cap of 16384 this is ~15 MiB, safely under the 32 MiB scoped
            # default on every generation, so no vmem_limit_bytes override.
        ),
    )(x, w1, b1, w2, b2, w3, b3)

    # Slice the zero-padded logit lanes back off (bf16, so this pass is cheap;
    # callers that can consume the padded slab may skip it entirely).
    return out[:, :num_classes]


def init_linear(key, in_features, out_features):
    """PyTorch nn.Linear default init: U(-1/sqrt(fan_in), 1/sqrt(fan_in))."""
    kw, kb = jax.random.split(key)
    bound = 1.0 / math.sqrt(in_features)
    # Stored as (in, out) so the kernel does x @ W.
    w = jax.random.uniform(kw, (in_features, out_features), jnp.float32,
                           minval=-bound, maxval=bound)
    b = jax.random.uniform(kb, (1, out_features), jnp.float32,
                           minval=-bound, maxval=bound)
    return w, b


def prepare_params(raw_params, hidden_pad=HIDDEN_PAD, class_pad=CLASS_PAD):
    """Zero-pad hidden/logit dims to lane-dense widths; cast weights to bf16.

    Zero padding is exact: padded output columns get pre-activation 0 (zero
    weight column + zero bias), ReLU(0)=0, and padded contraction rows are
    zero, so downstream results are unchanged.  The 57-wide feature dim is
    intentionally left unpadded (padding it would only add HBM read bytes).
    """
    w1, b1, w2, b2, w3, b3 = raw_params
    f, h1 = w1.shape
    _, h2 = w2.shape
    _, nc = w3.shape

    w1p = jnp.zeros((f, hidden_pad), jnp.float32).at[:, :h1].set(w1)
    b1p = jnp.zeros((1, hidden_pad), jnp.float32).at[:, :h1].set(b1)
    w2p = jnp.zeros((hidden_pad, hidden_pad), jnp.float32).at[:h1, :h2].set(w2)
    b2p = jnp.zeros((1, hidden_pad), jnp.float32).at[:, :h2].set(b2)
    w3p = jnp.zeros((hidden_pad, class_pad), jnp.float32).at[:h2, :nc].set(w3)
    b3p = jnp.zeros((1, class_pad), jnp.float32).at[:, :nc].set(b3)

    return (w1p.astype(jnp.bfloat16), b1p,
            w2p.astype(jnp.bfloat16), b2p,
            w3p.astype(jnp.bfloat16), b3p)


if __name__ == "__main__":
    batch = 8

    key = jax.random.PRNGKey(0)
    kx, k1, k2, k3 = jax.random.split(key, 4)

    x = jax.random.normal(kx, (batch, NUM_FEATURES), jnp.float32)
    w1, b1 = init_linear(k1, NUM_FEATURES, HIDDEN1)
    w2, b2 = init_linear(k2, HIDDEN1, HIDDEN2)
    w3, b3 = init_linear(k3, HIDDEN2, NUM_CLASSES)

    params = prepare_params((w1, b1, w2, b2, w3, b3))

    out = mlp_forward(x, params)
    out = jax.block_until_ready(out)

    # Pure-JAX reference mirroring the kernel numerics: bf16 operands, f32 MXU
    # accumulation, bf16 logit store (unpadded weights — zero padding is exact).
    bf = lambda a: a.astype(jnp.bfloat16)
    ref = jnp.maximum(
        jnp.dot(bf(x), bf(w1), preferred_element_type=jnp.float32) + b1, 0.0)
    ref = jnp.maximum(
        jnp.dot(bf(ref), bf(w2), preferred_element_type=jnp.float32) + b2, 0.0)
    ref = jnp.dot(bf(ref), bf(w3), preferred_element_type=jnp.float32) + b3
    ref = ref.astype(jnp.bfloat16)

    assert out.shape == (batch, NUM_CLASSES)
    assert out.dtype == jnp.bfloat16
    diff = jnp.max(jnp.abs(out.astype(jnp.float32) - ref.astype(jnp.float32)))
    assert jnp.allclose(out.astype(jnp.float32), ref.astype(jnp.float32),
                        atol=2e-2, rtol=2e-2), float(diff)

    print("KERNEL_OK")
</pallas_src>

<mosaic_0001>
module attributes {stable_mosaic.version = 11 : i64} {
  func.func @mlp_kernel(%arg0: i32, %arg1: memref<8x57xf32, #tpu.memory_space<vmem>>, %arg2: memref<57x128xbf16, #tpu.memory_space<vmem>>, %arg3: memref<1x128xf32, #tpu.memory_space<vmem>>, %arg4: memref<128x128xbf16, #tpu.memory_space<vmem>>, %arg5: memref<1x128xf32, #tpu.memory_space<vmem>>, %arg6: memref<128x128xbf16, #tpu.memory_space<vmem>>, %arg7: memref<1x128xf32, #tpu.memory_space<vmem>>, %arg8: memref<8x128xbf16, #tpu.memory_space<vmem>>) attributes {dimension_semantics = [#tpu.dimension_semantics<parallel>], iteration_bounds = array<i64: 1>, scalar_prefetch = 0 : i64, scratch_operands = 0 : i64, tpu.core_type = #tpu.core_type<tc>, window_params = [{transform_indices = @transform_0, window_bounds = array<i64: 8, 57>}, {pipeline_mode = #tpu.pipeline_mode<synchronous>, transform_indices = @transform_1, window_bounds = array<i64: 57, 128>}, {pipeline_mode = #tpu.pipeline_mode<synchronous>, transform_indices = @transform_2, window_bounds = array<i64: 1, 128>}, {pipeline_mode = #tpu.pipeline_mode<synchronous>, transform_indices = @transform_3, window_bounds = array<i64: 128, 128>}, {pipeline_mode = #tpu.pipeline_mode<synchronous>, transform_indices = @transform_4, window_bounds = array<i64: 1, 128>}, {pipeline_mode = #tpu.pipeline_mode<synchronous>, transform_indices = @transform_5, window_bounds = array<i64: 128, 128>}, {pipeline_mode = #tpu.pipeline_mode<synchronous>, transform_indices = @transform_6, window_bounds = array<i64: 1, 128>}, {transform_indices = @transform_7, window_bounds = array<i64: 8, 128>}]} {
    %c0 = arith.constant 0 : index
    %c0_0 = arith.constant 0 : index
    %0 = vector.load %arg1[%c0, %c0_0] : memref<8x57xf32, #tpu.memory_space<vmem>>, vector<8x57xf32>
    %1 = arith.truncf %0 : vector<8x57xf32> to vector<8x57xbf16>
    %c0_1 = arith.constant 0 : index
    %c0_2 = arith.constant 0 : index
    %2 = vector.load %arg2[%c0_1, %c0_2] : memref<57x128xbf16, #tpu.memory_space<vmem>>, vector<57x128xbf16>
    %cst = arith.constant dense<0.000000e+00> : vector<8x128xf32>
    %3 = tpu.matmul %1, %2, %cst {dimension_numbers = #tpu.dot_dimension_numbers<[1], [0], [0], [1], [0, 0, 1, 1], [], []>} : vector<8x57xbf16>, vector<57x128xbf16>, vector<8x128xf32> -> vector<8x128xf32>
    %c0_3 = arith.constant 0 : index
    %c0_4 = arith.constant 0 : index
    %4 = vector.load %arg3[%c0_3, %c0_4] : memref<1x128xf32, #tpu.memory_space<vmem>>, vector<1x128xf32>
    %5 = vector.broadcast %4 : vector<1x128xf32> to vector<8x128xf32>
    %6 = arith.addf %3, %5 : vector<8x128xf32>
    %cst_5 = arith.constant 0.000000e+00 : f32
    %7 = vector.broadcast %cst_5 : f32 to vector<8x128xf32>
    %8 = arith.maximumf %6, %7 : vector<8x128xf32>
    %9 = arith.truncf %8 : vector<8x128xf32> to vector<8x128xbf16>
    %c0_6 = arith.constant 0 : index
    %c0_7 = arith.constant 0 : index
    %10 = vector.load %arg4[%c0_6, %c0_7] : memref<128x128xbf16, #tpu.memory_space<vmem>>, vector<128x128xbf16>
    %cst_8 = arith.constant dense<0.000000e+00> : vector<8x128xf32>
    %11 = tpu.matmul %9, %10, %cst_8 {dimension_numbers = #tpu.dot_dimension_numbers<[1], [0], [0], [1], [0, 0, 1, 1], [], []>} : vector<8x128xbf16>, vector<128x128xbf16>, vector<8x128xf32> -> vector<8x128xf32>
    %c0_9 = arith.constant 0 : index
    %c0_10 = arith.constant 0 : index
    %12 = vector.load %arg5[%c0_9, %c0_10] : memref<1x128xf32, #tpu.memory_space<vmem>>, vector<1x128xf32>
    %13 = vector.broadcast %12 : vector<1x128xf32> to vector<8x128xf32>
    %14 = arith.addf %11, %13 : vector<8x128xf32>
    %cst_11 = arith.constant 0.000000e+00 : f32
    %15 = vector.broadcast %cst_11 : f32 to vector<8x128xf32>
    %16 = arith.maximumf %14, %15 : vector<8x128xf32>
    %17 = arith.truncf %16 : vector<8x128xf32> to vector<8x128xbf16>
    %c0_12 = arith.constant 0 : index
    %c0_13 = arith.constant 0 : index
    %18 = vector.load %arg6[%c0_12, %c0_13] : memref<128x128xbf16, #tpu.memory_space<vmem>>, vector<128x128xbf16>
    %cst_14 = arith.constant dense<0.000000e+00> : vector<8x128xf32>
    %19 = tpu.matmul %17, %18, %cst_14 {dimension_numbers = #tpu.dot_dimension_numbers<[1], [0], [0], [1], [0, 0, 1, 1], [], []>} : vector<8x128xbf16>, vector<128x128xbf16>, vector<8x128xf32> -> vector<8x128xf32>
    %c0_15 = arith.constant 0 : index
    %c0_16 = arith.constant 0 : index
    %20 = vector.load %arg7[%c0_15, %c0_16] : memref<1x128xf32, #tpu.memory_space<vmem>>, vector<1x128xf32>
    %21 = vector.broadcast %20 : vector<1x128xf32> to vector<8x128xf32>
    %22 = arith.addf %19, %21 : vector<8x128xf32>
    %23 = arith.truncf %22 : vector<8x128xf32> to vector<8x128xbf16>
    %c0_17 = arith.constant 0 : index
    %c0_18 = arith.constant 0 : index
    %24 = vector.load %arg8[%c0_17, %c0_18] : memref<8x128xbf16, #tpu.memory_space<vmem>>, vector<8x128xbf16>
    tpu.vector_store %arg8[%c0_17, %c0_18], %23 {strides = array<i32>} : memref<8x128xbf16, #tpu.memory_space<vmem>>, vector<8x128xbf16>,
    return
  }
  func.func @transform_0(%arg0: i32) -> (i32, i32) {
    %c0_i32 = arith.constant 0 : i32
    %c0_i32_0 = arith.constant 0 : i32
    return %arg0, %c0_i32 : i32, i32
  }
  func.func @transform_1(%arg0: i32) -> (i32, i32) {
    %c0_i32 = arith.constant 0 : i32
    %c0_i32_0 = arith.constant 0 : i32
    %c0_i32_1 = arith.constant 0 : i32
    return %c0_i32, %c0_i32_0 : i32, i32
  }
  func.func @transform_2(%arg0: i32) -> (i32, i32) {
    %c0_i32 = arith.constant 0 : i32
    %c0_i32_0 = arith.constant 0 : i32
    %c0_i32_1 = arith.constant 0 : i32
    return %c0_i32, %c0_i32_0 : i32, i32
  }
  func.func @transform_3(%arg0: i32) -> (i32, i32) {
    %c0_i32 = arith.constant 0 : i32
    %c0_i32_0 = arith.constant 0 : i32
    %c0_i32_1 = arith.constant 0 : i32
    return %c0_i32, %c0_i32_0 : i32, i32
  }
  func.func @transform_4(%arg0: i32) -> (i32, i32) {
    %c0_i32 = arith.constant 0 : i32
    %c0_i32_0 = arith.constant 0 : i32
    %c0_i32_1 = arith.constant 0 : i32
    return %c0_i32, %c0_i32_0 : i32, i32
  }
  func.func @transform_5(%arg0: i32) -> (i32, i32) {
    %c0_i32 = arith.constant 0 : i32
    %c0_i32_0 = arith.constant 0 : i32
    %c0_i32_1 = arith.constant 0 : i32
    return %c0_i32, %c0_i32_0 : i32, i32
  }
  func.func @transform_6(%arg0: i32) -> (i32, i32) {
    %c0_i32 = arith.constant 0 : i32
    %c0_i32_0 = arith.constant 0 : i32
    %c0_i32_1 = arith.constant 0 : i32
    return %c0_i32, %c0_i32_0 : i32, i32
  }
  func.func @transform_7(%arg0: i32) -> (i32, i32) {
    %c0_i32 = arith.constant 0 : i32
    %c0_i32_0 = arith.constant 0 : i32
    return %arg0, %c0_i32 : i32, i32
  }
}

</mosaic_0001>

<bundles_post_ra>
// kernel: mlp_forward.1
= control target key start
LH: loop header
LB: loop body
LE: loop exit
PB: predicated region body
PF: predicated region fallthrough
CT: control target
= control target key end

     0   :  { %12 = vsyncpa [#allocation3], 0  ;;  %s649_s0 = inlined_call_operand.hbm [shape: f32[8,57], index: 0, kind: input, shape index: {}]   ;;  %s650_s1 = inlined_call_operand.hbm [shape: bf16[57,128], index: 1, kind: input, shape index: {}]   ;;  %s651_s2 = inlined_call_operand.vmem [shape: f32[1,128], index: 2, kind: input, shape index: {}]   ;;  %s652_s3 = inlined_call_operand.hbm [shape: bf16[128,128], index: 3, kind: input, shape index: {}]   ;;  %s653_s4 = inlined_call_operand.vmem [shape: f32[1,128], index: 4, kind: input, shape index: {}]   ;;  %s654_s5 = inlined_call_operand.hbm [shape: bf16[128,128], index: 5, kind: input, shape index: {}]   ;;  %s655_s6 = inlined_call_operand.vmem [shape: f32[1,128], index: 6, kind: input, shape index: {}]   ;;  %s656_s7 = inlined_call_operand.hbm [shape: bf16[8,128], index: 7, kind: output, shape index: {}]  }
   0x1   :  { %13 = vsyncpa [#allocation6], 0 }
   0x2   :  { %14 = vsyncpa [#allocation9], 0  ;;  %s31_s26 = sshll.u32 %s650_s1, 4  ;;  %s32_s26 = int_to_ptr.hbm [resolvable:$true] %s31_s26 }
   0x3   :  { %15 = vsyncpa [#allocation4], 0  ;;  %s577_s27 = smov [#allocation5]   ;;  %s21_s8 = sshll.u32 %s649_s0, 4  ;;  %s22_s8 = int_to_ptr.hbm [resolvable:$true] %s21_s8 }
   0x4   :  { %s33_s28 = sshll.u32 %s577_s27, 4  ;;  %s578_s9 = smov 64   ;;  %s34_s28 = int_to_ptr.vmem [resolvable:$true] %s33_s28 }
   0x5   :  { %s579_s10 = smov 4   ;;  %s580_s11 = smov [#allocation2]  }
   0x6   :  { %39 = dma.hbm_to_vmem [thread:$0]  %s32_s26, 512, %s34_s28, [#allocation6], %s578_s9, %s578_s9, %s579_s10  }
   0x7   :  { %s23_s12 = sshll.u32 %s580_s11, 4  ;;  %s46_s15 = sshll.u32 %s652_s3, 4  ;;  %s24_s12 = int_to_ptr.vmem [resolvable:$true] %s23_s12  ;;  %s47_s15 = int_to_ptr.hbm [resolvable:$true] %s46_s15 }
   0x8   :  { %26 = dma.hbm_to_vmem [thread:$0]  %s22_s8, 128, %s24_s12, [#allocation3]  }
   0x9   :  { %s61_s17 = sshll.u32 %s654_s5, 4  ;;  %s581_s18 = smov [#allocation7]   ;;  %s62_s17 = int_to_ptr.hbm [resolvable:$true] %s61_s17 }
   0xa   :  { %s48_s19 = sshll.u32 %s581_s18, 4  ;;  %s582_s0 = smov [#allocation8]   ;;  %s49_s19 = int_to_ptr.vmem [resolvable:$true] %s48_s19 }
   0xb   :  { %54 = dma.hbm_to_vmem [thread:$0]  %s47_s15, 1024, %s49_s19, [#allocation6], %s578_s9, %s578_s9, %s579_s10  }
   0xc   :  { %s63_s20 = sshll.u32 %s582_s0, 4  ;;  %s64_s20 = int_to_ptr.vmem [resolvable:$true] %s63_s20 }
   0xd   :  { %69 = dma.hbm_to_vmem [thread:$0]  %s62_s17, 1024, %s64_s20, [#allocation9], %s578_s9, %s578_s9, %s579_s10  }
   0xe   :  { %569 = dma.done.wait [#allocation3], 128  }
   0xf   :  { %570 = vsyncadd [#allocation3], 4294967168 }
  0x10   :  { %571 = dma.done.wait [#allocation6], 1536  }
  0x11   :  { %572 = vsyncadd [#allocation6], 4294965760 }
  0x12   :  { %573 = dma.done.wait [#allocation9], 1024  }
  0x13   :  { %574 = vsyncadd [#allocation9], 4294966272  ;;  %vm130_vm0 = vcmask 1043456   ;;  %vm131_vm1 = vcmask 1044480   ;;  %v583_v0 = vmov 65535   ;;  %v429_v6 = vld [vmem:[#allocation7 + $0x38] sm:$0xff] }
  0x14   :  { %v132_v1 = vsel %vm130_vm0, 4294967295, %v583_v0  ;;  %v351_v2 = vld [vmem:[#allocation5 + $0x18] sm:$0xf]  ;;  %v421_v3 = vld [vmem:[#allocation5 + $0x18] sm:$0x10]  ;;  %220 = vmatpush.bf16.msra.mxu1 %v429_v6  ;;  %v428_v8 = vld [vmem:[#allocation7 + $0x30] sm:$0xff] }
  0x15   :  { %v133_v4 = vsel %vm131_vm1, %v132_v1, 0  ;;  %v352_v5 = vor.u32 %v421_v3, %v351_v2  ;;  %v420_v9 = vld [vmem:[#allocation5 + $0x10] sm:$0xff]  ;;  %v427_v10 = vld [vmem:[#allocation7 + $0x28] sm:$0xff]  ;;  %v426_v12 = vld [vmem:[#allocation7 + $0x20] sm:$0xff]  ;;  %vm126_vm2 = vcmask 465920   ;;  %s584_s24 = smov [#allocation10]  }
  0x16   :  { %v419_v11 = vld [vmem:[#allocation5 + $0x8] sm:$0xff]  ;;  %v418_v13 = vld [vmem:[#allocation5] sm:$0xff]  ;;  %v89_v14 = vld [vmem:[#allocation2] sm:$0xff]  ;;  %s323_s25 = sshll.u32 %s584_s24, 4  ;;  %s325_s28 = sshll.u32 %s656_s7, 4  ;;  %s324_s25 = int_to_ptr.vmem [resolvable:$true] %s323_s25  ;;  %s326_s28 = int_to_ptr.hbm [resolvable:$true] %s325_s28 }
  0x17   :  { %v135_v7 = vand.u32 %v352_v5, %v133_v4  ;;  %v90_v15 = vpack.c.bf16 %v89_v14, %v89_v14  ;;  %v425_v16 = vld [vmem:[#allocation7 + $0x18] sm:$0xff]  ;;  %v424_v17 = vld [vmem:[#allocation7 + $0x10] sm:$0xff]  ;;  %v423_v18 = vld [vmem:[#allocation7 + $0x8] sm:$0xff] }
  0x18   :  { %221 = vmatpush.bf16.msra.mxu1 %v428_v8  ;;  %v422_v19 = vld [vmem:[#allocation7] sm:$0xff]  ;;  %v437_v20 = vld [vmem:[#allocation8 + $0x38] sm:$0xff]  ;;  %v436_v21 = vld [vmem:[#allocation8 + $0x30] sm:$0xff] }
  0x19   :  { %141 = vmatpush.bf16.msra.mxu0 %v135_v7  ;;  %303 = vmatpush.bf16.msra.mxu2 %v437_v20  ;;  %v435_v22 = vld [vmem:[#allocation8 + $0x28] sm:$0xff]  ;;  %v434_v23 = vld [vmem:[#allocation8 + $0x20] sm:$0xff]  ;;  %v433_v24 = vld [vmem:[#allocation8 + $0x18] sm:$0xff] }
  0x1a   :  { %v432_v25 = vld [vmem:[#allocation8 + $0x10] sm:$0xff]  ;;  %v446_v26 = vld [vmem:[%s651_s2] ss:$0 sm:$0xff]  ;;  %v431_v32 = vld [vmem:[#allocation8 + $0x8] sm:$0xff] }
  0x1b   :  { %v430_v33 = vld [vmem:[#allocation8] sm:$0xff]  ;;  %v447_v34 = vld [vmem:[%s653_s4] ss:$0 sm:$0xff] }
  0x1c   :  { %222 = vmatpush.bf16.msra.mxu1 %v427_v10  ;;  %v448_v40 = vld [vmem:[%s655_s6] ss:$0 sm:$0xff] }
  0x1d   :  { %142 = vmatpush.bf16.msra.mxu0 %v420_v9  ;;  %304 = vmatpush.bf16.msra.mxu2 %v436_v21 }
  0x20   :  { %223 = vmatpush.bf16.msra.mxu1 %v426_v12 }
  0x21   :  { %143 = vmatpush.bf16.msra.mxu0 %v419_v11  ;;  %305 = vmatpush.bf16.msra.mxu2 %v435_v22 }
  0x24   :  { %224 = vmatpush.bf16.msra.mxu1 %v425_v16 }
  0x25   :  { %144 = vmatpush.bf16.msra.mxu0 %v418_v13  ;;  %306 = vmatpush.bf16.msra.mxu2 %v434_v23 }
  0x28   :  { %353 = vmatmul.msk.bf16.vlgmr.msra.gmra.mxu0 %vm126_vm2, %v90_v15  ;;  %225 = vmatpush.bf16.msra.mxu1 %v424_v17 }
  0x29   :  { %307 = vmatpush.bf16.msra.mxu2 %v433_v24 }
  0x2c   :  { %226 = vmatpush.bf16.msra.mxu1 %v423_v18 }
  0x2d   :  { %308 = vmatpush.bf16.msra.mxu2 %v432_v25 }
  0x30   :  { %227 = vmatpush.bf16.msra.mxu1 %v422_v19 }
  0x31   :  { %309 = vmatpush.bf16.msra.mxu2 %v431_v32 }
  0x35   :  { %310 = vmatpush.bf16.msra.mxu2 %v430_v33 }
  0xa5   :  { %v146_v27 = vpop.f32.mrf.mxu0 }
  0xa6   :  { %v147_v28 = vadd.f32 %v446_v26, %v146_v27 }
  0xa8   :  { %v150_v29 = vmax.f32 %v147_v28, 0.0 }
  0xaa   :  { %v151_v30 = vpack.c.bf16 %v150_v29, %v150_v29 }
  0xac   :  { %228 = vmatmul.bf16.vlgmr.msra.gmra.mxu1 %v151_v30 }
  0xad   :  { %v148_v31 = vpop.f32.mrf.mxu0 }
 0x129   :  { %v229_v35 = vpop.f32.mrf.mxu1 }
 0x12a   :  { %v230_v36 = vadd.f32 %v447_v34, %v229_v35 }
 0x12c   :  { %v233_v37 = vmax.f32 %v230_v36, 0.0 }
 0x12e   :  { %v234_v38 = vpack.c.bf16 %v233_v37, %v233_v37 }
 0x130   :  { %311 = vmatmul.bf16.vlgmr.msra.gmra.mxu2 %v234_v38 }
 0x131   :  { %v231_v39 = vpop.f32.mrf.mxu1 }
 0x1b3   :  { %v312_v41 = vpop.f32.mrf.mxu2 }
 0x1b4   :  { %v313_v42 = vadd.f32 %v448_v40, %v312_v41 }
 0x1b6   :  { %v316_v43 = vpack.c.bf16 %v313_v42, %v313_v42 }
 0x1b8   :  { %317 = vst [vmem:[#allocation10] sm:$0xf] %v316_v43 }
 0x1b9   :  { %328 = dma.vmem_to_hbm [thread:$0]  %s324_s25, 64, %s326_s28, [#allocation4]  }
 0x1bb   :  { %v314_v44 = vpop.f32.mrf.mxu2 }
 0x1bc   :  { %575 = dma.done.wait [#allocation4], 64  }
 0x1bd   :  { %576 = vsyncadd [#allocation4], 4294967232 }
 0x1be   :  { %333 = vsyncpa [#allocation3], 1 }
 0x1bf   :  { %334 = vsyncpa [#allocation6], 1 }
 0x1c0   :  { %335 = vsyncpa [#allocation9], 1 }
 0x1c1   :  { %336 = vsyncpa [#allocation4], 1 }

</bundles_post_ra>
